<compile_context>
chip_gen: v6e
topology: v6e:2x2x1
jax: 0.10.0
libtpu: 0.0.40
codegen_flags: <defaults>
</compile_context>

<pallas_src>
import functools
import math

import jax
import jax.numpy as jnp
from jax.experimental import pallas as pl
from jax.experimental.pallas import tpu as pltpu


# ---------------------------------------------------------------------------
# Streaming kernel for a pre-stacked (N, M, D) weight tensor, flattened to
# (N*M, D) and walked in large row tiles. Accumulator is a per-core resident
# (chunk_rows, D) f32 block; the scalar reduce happens once, outside.
# ---------------------------------------------------------------------------
def _l1_stream_kernel(labels_ref, w_ref, acc_ref, *,
                      total_rows, tile_rows, chunk_rows, needs_mask):
    i = pl.program_id(1)                                   # reduction step
    gstep = pl.program_id(0) * pl.num_programs(1) + i      # global tile index
    row0 = gstep * tile_rows
    num_chunks = tile_rows // chunk_rows

    @pl.when(i == 0)
    def _():
        acc_ref[...] = jnp.zeros_like(acc_ref)

    # Resident labels tile (chunk_rows, D), already row-replicated in wrapper.
    lab = labels_ref[...].astype(jnp.float32)

    def add_chunk(c, masked):
        start = pl.multiple_of(c * chunk_rows, chunk_rows)
        x = w_ref[pl.ds(start, chunk_rows), :].astype(jnp.float32)
        ad = jnp.abs(x - lab)
        if masked:
            r = (row0 + start
                 + jax.lax.broadcasted_iota(jnp.int32, (chunk_rows, 1), 0))
            ad = jnp.where(r < total_rows, ad, 0.0)        # select, not 0/1 mul
        acc_ref[...] += ad

    def run(masked):
        if num_chunks == 1:
            add_chunk(0, masked)
        else:
            def body(c, carry):
                add_chunk(c, masked)
                return carry
            jax.lax.fori_loop(0, num_chunks, body, 0,
                              unroll=min(4, num_chunks))

    if needs_mask:
        is_full = (row0 + tile_rows) <= total_rows

        @pl.when(is_full)
        def _():
            run(False)                                     # hot path: no mask

        @pl.when(jnp.logical_not(is_full))
        def _():
            run(True)                                      # partial/padded tile
    else:
        run(False)


def _l1_sum_stacked(w_stack, labels_w, *, tile_rows=None, chunk_rows=None):
    """sum_i ||labels_w - w_stack[i]||_1 for a pre-stacked (N, M, D) array."""
    n, m, d = w_stack.shape
    assert labels_w.shape == (m, d), (labels_w.shape, (m, d))
    total_rows = n * m
    w_flat = w_stack.reshape(total_rows, d)                # free reshape
    itemsize = w_flat.dtype.itemsize

    # --- chunk size: unit of in-kernel accumulation (bounds f32 temps) -------
    base = (m * 8) // math.gcd(m, 8)                       # lcm(m, 8)
    max_chunk = base * (-(-total_rows // base))
    if chunk_rows is None:
        tgt = max(1, min(256, (2 << 20) // max(1, d * itemsize)))
        chunk_rows = base * max(1, tgt // base)
    else:
        chunk_rows = base * (-(-chunk_rows // base))
    chunk_rows = min(chunk_rows, max_chunk)

    # --- tile size: ~4 MiB of native-dtype rows per streamed buffer ----------
    if tile_rows is None:
        rows_target = max(1, (4 << 20) // max(1, d * itemsize))
        tile_rows = chunk_rows * max(1, rows_target // chunk_rows)
    else:
        tile_rows = chunk_rows * (-(-tile_rows // chunk_rows))
    tile_rows = min(tile_rows, chunk_rows * (-(-total_rows // chunk_rows)))

    grid_n = -(-total_rows // tile_rows)
    num_cores = 2 if grid_n >= 2 else 1                    # v7x megacore split
    steps = -(-grid_n // num_cores)
    needs_mask = num_cores * steps * tile_rows > total_rows

    if num_cores * steps == grid_n:
        w_map = lambda p, i: (p * steps + i, 0)
    else:
        last = grid_n - 1
        w_map = lambda p, i: (jnp.minimum(p * steps + i, last), 0)

    # Labels replicated once to one chunk of rows (tiny, resident in VMEM).
    labels_tiled = jnp.broadcast_to(
        labels_w[None, :, :], (chunk_rows // m, m, d)).reshape(chunk_rows, d)

    kernel = functools.partial(
        _l1_stream_kernel, total_rows=total_rows, tile_rows=tile_rows,
        chunk_rows=chunk_rows, needs_mask=needs_mask)

    tile_bytes = tile_rows * d * itemsize
    chunk_f32 = chunk_rows * d * 4
    vmem_limit = int(min(48 << 20,
                         max(32 << 20,
                             2 * tile_bytes + 8 * chunk_f32 + (2 << 20))))

    cost = pl.CostEstimate(
        flops=3 * total_rows * d,
        bytes_accessed=(total_rows * d * itemsize
                        + chunk_rows * d * labels_tiled.dtype.itemsize
                        + num_cores * chunk_rows * d * 4),
        transcendentals=0)

    acc = pl.pallas_call(
        kernel,
        out_shape=jax.ShapeDtypeStruct((num_cores, chunk_rows, d), jnp.float32),
        grid=(num_cores, steps),
        in_specs=[
            pl.BlockSpec((chunk_rows, d), lambda p, i: (0, 0)),  # labels (resident)
            pl.BlockSpec((tile_rows, d), w_map),                 # streamed row tile
        ],
        out_specs=pl.BlockSpec((None, chunk_rows, d),
                               lambda p, i: (p, 0, 0)),          # per-core acc
        compiler_params=pltpu.CompilerParams(
            dimension_semantics=("parallel", "arbitrary"),
            vmem_limit_bytes=vmem_limit),
        cost_estimate=cost,
    )(labels_tiled, w_flat)

    return jnp.sum(acc)                                    # one final reduce


# ---------------------------------------------------------------------------
# List path: each weight tensor is its own pallas_call input (no jnp.stack
# copy), summed in a single kernel; grid tiles the M rows ("parallel").
# ---------------------------------------------------------------------------
def _l1_sum_list(w_list, labels_w):
    n = len(w_list)
    m, d = labels_w.shape
    for w in w_list:
        assert w.shape == (m, d), (w.shape, (m, d))
    itemsize = max(w.dtype.itemsize for w in w_list)

    # Row-tile budget: (n+1) double-buffered inputs + f32 out + f32 temps.
    per_row = d * ((n + 1) * itemsize * 2 + 4 * 2 + 4 * 3)
    rows_budget = max(1, (24 << 20) // per_row)
    if m <= rows_budget:
        tile_m = m
    else:
        tile_m = max(8, (min(rows_budget, m) // 8) * 8)
    grid_n = -(-m // tile_m)

    def kernel(labels_ref, *rest):
        w_refs, out_ref = rest[:-1], rest[-1]
        lab = labels_ref[...].astype(jnp.float32)
        acc = jnp.abs(lab - w_refs[0][...].astype(jnp.float32))
        for wr in w_refs[1:]:
            acc = acc + jnp.abs(lab - wr[...].astype(jnp.float32))
        out_ref[...] = acc

    spec = pl.BlockSpec((tile_m, d), lambda i: (i, 0))
    cost = pl.CostEstimate(
        flops=3 * n * m * d,
        bytes_accessed=(n + 1) * m * d * itemsize + m * d * 4,
        transcendentals=0)
    vmem_limit = int(min(48 << 20, max(32 << 20, per_row * tile_m + (2 << 20))))

    out = pl.pallas_call(
        kernel,
        out_shape=jax.ShapeDtypeStruct((m, d), jnp.float32),
        grid=(grid_n,),
        in_specs=[spec] * (n + 1),
        out_specs=spec,
        compiler_params=pltpu.CompilerParams(
            dimension_semantics=("parallel",),
            vmem_limit_bytes=vmem_limit),
        cost_estimate=cost,
    )(labels_w, *w_list)

    return jnp.sum(out)


def my_loss(w_all, labels_w, loss, weight=0.001, *, tile_rows=None, chunk_rows=None):
    """Returns f32 scalar: loss + weight * sum_i ||labels_w - w_all[i]||_1.

    w_all: list/tuple of (M, D) arrays, or a pre-stacked (N, M, D) array.
    """
    if isinstance(w_all, (list, tuple)):
        if len(w_all) == 0:
            l1 = jnp.float32(0.0)
        else:
            l1 = _l1_sum_list(list(w_all), labels_w)
    else:
        l1 = _l1_sum_stacked(w_all, labels_w,
                             tile_rows=tile_rows, chunk_rows=chunk_rows)
    return jnp.asarray(loss, jnp.float32) + jnp.float32(weight) * l1


if __name__ == "__main__":
    key = jax.random.PRNGKey(0)
    k1, k2, k3, k4, k5, k6, k7 = jax.random.split(key, 7)
    M, D = 8, 128

    # --- Test 1: list of f32 weights -> multi-input list kernel (no stack) ---
    w_all = [
        jax.random.normal(k1, (M, D), jnp.float32),
        jax.random.normal(k2, (M, D), jnp.float32),
        jax.random.normal(k3, (M, D), jnp.float32),
    ]
    labels_w = jax.random.normal(k4, (M, D), jnp.float32)
    base_loss = jax.random.uniform(k5, (), jnp.float32)

    result = my_loss(w_all, labels_w, base_loss, weight=0.001)
    jax.block_until_ready(result)
    ref = base_loss + 0.001 * sum(jnp.sum(jnp.abs(labels_w - w)) for w in w_all)
    assert jnp.allclose(result, ref, rtol=1e-5, atol=1e-5), (result, ref)

    # --- Test 2: pre-stacked bf16 weights, auto tiling (single big tile) -----
    N2 = 20
    w_stack2 = jax.random.normal(k6, (N2, M, D), jnp.float32).astype(jnp.bfloat16)
    labels2 = jax.random.normal(k7, (M, D), jnp.float32).astype(jnp.bfloat16)
    ref2 = base_loss + 0.001 * jnp.sum(
        jnp.abs(labels2.astype(jnp.float32)[None] - w_stack2.astype(jnp.float32)))

    result2 = my_loss(w_stack2, labels2, base_loss, weight=0.001)
    jax.block_until_ready(result2)
    assert jnp.allclose(result2, ref2, rtol=1e-4, atol=1e-4), (result2, ref2)

    # --- Test 3: forced small tiles -> exercises multi-step grid, 2-way core
    # split, clamped index map, gated partial-tile masking, chunk loop --------
    result3 = my_loss(w_stack2, labels2, base_loss, weight=0.001,
                      tile_rows=64, chunk_rows=32)
    jax.block_until_ready(result3)
    assert jnp.allclose(result3, ref2, rtol=1e-4, atol=1e-4), (result3, ref2)

    print("KERNEL_OK")
</pallas_src>

<mosaic_0001>
module attributes {stable_mosaic.version = 11 : i64} {
  func.func @kernel(%arg0: i32, %arg1: memref<8x128xf32, #tpu.memory_space<vmem>>, %arg2: memref<8x128xf32, #tpu.memory_space<vmem>>, %arg3: memref<8x128xf32, #tpu.memory_space<vmem>>, %arg4: memref<8x128xf32, #tpu.memory_space<vmem>>, %arg5: memref<8x128xf32, #tpu.memory_space<vmem>>) attributes {dimension_semantics = [#tpu.dimension_semantics<parallel>], iteration_bounds = array<i64: 1>, scalar_prefetch = 0 : i64, scratch_operands = 0 : i64, tpu.core_type = #tpu.core_type<tc>, window_params = [{transform_indices = @transform_0, window_bounds = array<i64: 8, 128>}, {transform_indices = @transform_1, window_bounds = array<i64: 8, 128>}, {transform_indices = @transform_2, window_bounds = array<i64: 8, 128>}, {transform_indices = @transform_3, window_bounds = array<i64: 8, 128>}, {transform_indices = @transform_4, window_bounds = array<i64: 8, 128>}]} {
    %c0 = arith.constant 0 : index
    %c0_0 = arith.constant 0 : index
    %0 = vector.load %arg1[%c0, %c0_0] : memref<8x128xf32, #tpu.memory_space<vmem>>, vector<8x128xf32>
    %c0_1 = arith.constant 0 : index
    %c0_2 = arith.constant 0 : index
    %1 = vector.load %arg2[%c0_1, %c0_2] : memref<8x128xf32, #tpu.memory_space<vmem>>, vector<8x128xf32>
    %2 = arith.subf %0, %1 : vector<8x128xf32>
    %3 = math.absf %2 : vector<8x128xf32>
    %c0_3 = arith.constant 0 : index
    %c0_4 = arith.constant 0 : index
    %4 = vector.load %arg3[%c0_3, %c0_4] : memref<8x128xf32, #tpu.memory_space<vmem>>, vector<8x128xf32>
    %5 = arith.subf %0, %4 : vector<8x128xf32>
    %6 = math.absf %5 : vector<8x128xf32>
    %7 = arith.addf %3, %6 : vector<8x128xf32>
    %c0_5 = arith.constant 0 : index
    %c0_6 = arith.constant 0 : index
    %8 = vector.load %arg4[%c0_5, %c0_6] : memref<8x128xf32, #tpu.memory_space<vmem>>, vector<8x128xf32>
    %9 = arith.subf %0, %8 : vector<8x128xf32>
    %10 = math.absf %9 : vector<8x128xf32>
    %11 = arith.addf %7, %10 : vector<8x128xf32>
    %c0_7 = arith.constant 0 : index
    %c0_8 = arith.constant 0 : index
    %12 = vector.load %arg5[%c0_7, %c0_8] : memref<8x128xf32, #tpu.memory_space<vmem>>, vector<8x128xf32>
    tpu.vector_store %arg5[%c0_7, %c0_8], %11 {strides = array<i32>} : memref<8x128xf32, #tpu.memory_space<vmem>>, vector<8x128xf32>,
    return
  }
  func.func @transform_0(%arg0: i32) -> (i32, i32) {
    %c0_i32 = arith.constant 0 : i32
    %c0_i32_0 = arith.constant 0 : i32
    return %arg0, %c0_i32 : i32, i32
  }
  func.func @transform_1(%arg0: i32) -> (i32, i32) {
    %c0_i32 = arith.constant 0 : i32
    %c0_i32_0 = arith.constant 0 : i32
    return %arg0, %c0_i32 : i32, i32
  }
  func.func @transform_2(%arg0: i32) -> (i32, i32) {
    %c0_i32 = arith.constant 0 : i32
    %c0_i32_0 = arith.constant 0 : i32
    return %arg0, %c0_i32 : i32, i32
  }
  func.func @transform_3(%arg0: i32) -> (i32, i32) {
    %c0_i32 = arith.constant 0 : i32
    %c0_i32_0 = arith.constant 0 : i32
    return %arg0, %c0_i32 : i32, i32
  }
  func.func @transform_4(%arg0: i32) -> (i32, i32) {
    %c0_i32 = arith.constant 0 : i32
    %c0_i32_0 = arith.constant 0 : i32
    return %arg0, %c0_i32 : i32, i32
  }
}

</mosaic_0001>

<bundles_post_ra>
// kernel: tpu_custom_call.1
= control target key start
LH: loop header
LB: loop body
LE: loop exit
PB: predicated region body
PF: predicated region fallthrough
CT: control target
= control target key end

     0   :  { %9 = vsyncpa [#allocation3], 0  ;;  %s253_s0 = inlined_call_operand.hbm [shape: f32[8,128], index: 0, kind: input, shape index: {}]   ;;  %s254_s1 = inlined_call_operand.hbm [shape: f32[8,128], index: 1, kind: input, shape index: {}]   ;;  %s255_s2 = inlined_call_operand.hbm [shape: f32[8,128], index: 2, kind: input, shape index: {}]   ;;  %s256_s3 = inlined_call_operand.hbm [shape: f32[8,128], index: 3, kind: input, shape index: {}]   ;;  %s257_s4 = inlined_call_operand.hbm [shape: f32[8,128], index: 4, kind: output, shape index: {}]  }
   0x1   :  { %10 = vsyncpa [#allocation6], 0 }
   0x2   :  { %11 = vsyncpa [#allocation9], 0 }
   0x3   :  { %12 = vsyncpa [#allocation4], 0  ;;  %s208_s15 = smov [#allocation5]   ;;  %s209_s17 = smov [#allocation2]  }
   0x4   :  { %s29_s16 = sshll.u32 %s208_s15, 4  ;;  %s19_s18 = sshll.u32 %s209_s17, 4  ;;  %s30_s16 = int_to_ptr.vmem [resolvable:$true] %s29_s16  ;;  %s20_s18 = int_to_ptr.vmem [resolvable:$true] %s19_s18 }
   0x5   :  { %s108_s19 = scalar_lea.vmem %s30_s16, 128  ;;  %p113_p1 = scmp.lt.s32.totalorder %s30_s16, %s30_s16 }
   0x6   :  { %p109_p0 = scmp.ne.s32.totalorder %s30_s16, %s108_s19  ;;  %p114_p2 = scmp.lt.s32.totalorder %s108_s19, %s108_s19 }
   0x8   :  { %p115_p3 = por %p114_p2, %p113_p1 }
   0xa   :  { %p116_p4 = pnand %p115_p3, %p109_p0 }
   0xc   :  { %119 = shalt.err (!%p116_p4)
}
   0xd   :  { %32 = dma.hbm_to_vmem [thread:$0]  %s254_s1, 128, %s30_s16, [#allocation6]  }
   0xe   :  { %s128_s22 = scalar_lea.vmem %s20_s18, 128  ;;  %p133_p6 = scmp.lt.s32.totalorder %s20_s18, %s20_s18 }
   0xf   :  { %p129_p5 = scmp.ne.s32.totalorder %s20_s18, %s128_s22  ;;  %p134_p7 = scmp.lt.s32.totalorder %s128_s22, %s128_s22 }
  0x11   :  { %p135_p8 = por %p134_p7, %p133_p6 }
  0x13   :  { %p136_p9 = pnand %p135_p8, %p129_p5 }
  0x15   :  { %139 = shalt.err (!%p136_p9)
}
  0x16   :  { %22 = dma.hbm_to_vmem [thread:$0]  %s253_s0, 128, %s20_s18, [#allocation3]  }
  0x17   :  { %s210_s25 = smov [#allocation7]   ;;  %s211_s27 = smov [#allocation8]  }
  0x18   :  { %s39_s26 = sshll.u32 %s210_s25, 4  ;;  %s49_s28 = sshll.u32 %s211_s27, 4  ;;  %s40_s26 = int_to_ptr.vmem [resolvable:$true] %s39_s26  ;;  %s50_s28 = int_to_ptr.vmem [resolvable:$true] %s49_s28 }
  0x19   :  { %s148_s29 = scalar_lea.vmem %s40_s26, 128  ;;  %p153_p11 = scmp.lt.s32.totalorder %s40_s26, %s40_s26 }
  0x1a   :  { %p149_p10 = scmp.ne.s32.totalorder %s40_s26, %s148_s29  ;;  %p154_p12 = scmp.lt.s32.totalorder %s148_s29, %s148_s29 }
  0x1c   :  { %p155_p13 = por %p154_p12, %p153_p11 }
  0x1e   :  { %p156_p0 = pnand %p155_p13, %p149_p10 }
  0x20   :  { %159 = shalt.err (!%p156_p0)
}
  0x21   :  { %42 = dma.hbm_to_vmem [thread:$0]  %s255_s2, 128, %s40_s26, [#allocation6]  }
  0x22   :  { %s168_s5 = scalar_lea.vmem %s50_s28, 128  ;;  %p173_p2 = scmp.lt.s32.totalorder %s50_s28, %s50_s28 }
  0x23   :  { %p169_p1 = scmp.ne.s32.totalorder %s50_s28, %s168_s5  ;;  %p174_p3 = scmp.lt.s32.totalorder %s168_s5, %s168_s5 }
  0x25   :  { %p175_p4 = por %p174_p3, %p173_p2 }
  0x27   :  { %p176_p5 = pnand %p175_p4, %p169_p1 }
  0x29   :  { %179 = shalt.err (!%p176_p5)
}
  0x2a   :  { %52 = dma.hbm_to_vmem [thread:$0]  %s256_s3, 128, %s50_s28, [#allocation9]  }
  0x2b   :  { %200 = dma.done.wait [#allocation3], 128  }
  0x2c   :  { %201 = vsyncadd [#allocation3], 4294967168 }
  0x2d   :  { %202 = dma.done.wait [#allocation6], 256  }
  0x2e   :  { %203 = vsyncadd [#allocation6], 4294967040 }
  0x2f   :  { %204 = dma.done.wait [#allocation9], 128  }
  0x30   :  { %205 = vsyncadd [#allocation9], 4294967168  ;;  %v65_v0 = vld [vmem:[#allocation2] sm:$0xff]  ;;  %v66_v1 = vld [vmem:[#allocation5] sm:$0xff]  ;;  %s212_s2 = smov [#allocation10]  }
  0x31   :  { %v69_v2 = vld [vmem:[#allocation7] sm:$0xff]  ;;  %v67_v3 = vsub.f32 %v65_v0, %v66_v1  ;;  %v73_v5 = vld [vmem:[#allocation8] sm:$0xff]  ;;  %s84_s7 = sshll.u32 %s212_s2, 4  ;;  %s85_s7 = int_to_ptr.vmem [resolvable:$true] %s84_s7 }
  0x32   :  { %v70_v4 = vsub.f32 %v65_v0, %v69_v2  ;;  %v74_v6 = vsub.f32 %v65_v0, %v73_v5  ;;  %s180_s3 = scalar_lea.vmem %s85_s7, 128  ;;  %p185_p7 = scmp.lt.s32.totalorder %s85_s7, %s85_s7 }
  0x33   :  { %v68_v7 = vand.u32 2147483647, %v67_v3  ;;  %p181_p6 = scmp.ne.s32.totalorder %s85_s7, %s180_s3  ;;  %p186_p8 = scmp.lt.s32.totalorder %s180_s3, %s180_s3 }
  0x34   :  { %v71_v8 = vand.u32 2147483647, %v70_v4  ;;  %v75_v9 = vand.u32 2147483647, %v74_v6 }
  0x35   :  { %p187_p9 = por %p186_p8, %p185_p7 }
  0x36   :  { %v72_v10 = vadd.f32 %v71_v8, %v68_v7 }
  0x37   :  { %p188_p10 = pnand %p187_p9, %p181_p6 }
  0x38   :  { %v76_v11 = vadd.f32 %v75_v9, %v72_v10 }
  0x3a   :  { %77 = vst [vmem:[#allocation10] sm:$0xff] %v76_v11 }
  0x3b   :  { %191 = shalt.err (!%p188_p10)
}
  0x3c   :  { %87 = dma.vmem_to_hbm [thread:$0]  %s85_s7, 128, %s257_s4, [#allocation4]  }
  0x3d   :  { %206 = dma.done.wait [#allocation4], 128  }
  0x3e   :  { %207 = vsyncadd [#allocation4], 4294967168 }
  0x3f   :  { %91 = vsyncpa [#allocation3], 1 }
  0x40   :  { %92 = vsyncpa [#allocation6], 1 }
  0x41   :  { %93 = vsyncpa [#allocation9], 1 }
  0x42   :  { %94 = vsyncpa [#allocation4], 1 }

</bundles_post_ra>
